<compile_context>
chip_gen: v5e
topology: v5e:2x2
jax: 0.10.0
libtpu: 0.0.40
codegen_flags: <defaults>
</compile_context>

<pallas_src>
import functools

import jax
import jax.numpy as jnp
from jax import lax
from jax.experimental import pallas as pl
from jax.experimental.pallas import tpu as pltpu

_LANE = 128
_NSTAT = 4                       # intersection, prob-sum, one-hot count, CE partial
_MAX_S_TILE = 2048               # practical cap: 2048 * 128 = 262144 pixels / step
_VMEM_TILE_BUDGET = 20 * 1024 * 1024   # for double-buffered inputs + resident output


def _combined_loss_stats_kernel(preds_ref, tgt_ref, out_ref, *, has_pad):
    # preds_ref: (1, C, S_TILE, 128)  logits tile (input dtype)
    # tgt_ref:   (1, S_TILE, 128)     int32 targets (-1 marks padded pixels)
    # out_ref:   (1, 4, C, 128)       f32 lane-partial accumulators, resident across h
    h = pl.program_id(2)

    @pl.when(h == 0)
    def _init():
        out_ref[...] = jnp.zeros_like(out_ref)

    logits = preds_ref[0].astype(jnp.float32)        # (C, St, 128)
    tgt = tgt_ref[0]                                 # (St, 128) int32
    C = logits.shape[0]

    # --- softmax over the class (slab) axis: elementwise VPU ops across C slabs ---
    m = jnp.max(logits, axis=0, keepdims=True)       # (1, St, 128)
    shifted = logits - m                             # (C, St, 128)
    e = jnp.exp(shifted)
    s = jnp.sum(e, axis=0, keepdims=True)            # (1, St, 128)
    # approx=True would push this to the EUP on v7x but loosens precision; keep exact.
    inv_s = pl.reciprocal(s, approx=False)
    log_s = jnp.log(s)                               # (1, St, 128)
    probs = e * inv_s                                # (C, St, 128)

    # --- one-hot as a predicate (padded pixels have tgt=-1 -> never match) ---
    cls_idx = lax.broadcasted_iota(jnp.int32, logits.shape, 0)
    mask = cls_idx == tgt[None, :, :]                # (C, St, 128) bool
    zero = jnp.float32(0.0)

    # Reduce over the sublane (St) axis only -> lane-dense (C, 128) partials.
    inter = jnp.sum(jnp.where(mask, probs, zero), axis=1)            # dice intersection
    cnt = jnp.sum(mask.astype(jnp.float32), axis=1)                  # one-hot counts
    shifted_tgt = jnp.sum(jnp.where(mask, shifted, zero), axis=1)    # shifted[target] sums

    if has_pad:
        valid = tgt >= 0                                             # (St, 128) bool
        psum = jnp.sum(jnp.where(valid[None, :, :], probs, zero), axis=1)
        logs_lane = jnp.sum(jnp.where(valid, log_s[0], zero), axis=0,
                            keepdims=True)                            # (1, 128)
    else:
        psum = jnp.sum(probs, axis=1)
        logs_lane = jnp.sum(log_s[0], axis=0, keepdims=True)          # (1, 128)

    # CE partial: sum_pixels(log_s) lives in class-row 0; the per-class shifted[target]
    # sums are subtracted from every row.  The epilogue only ever takes a full sum of
    # this plane, so ce_total = sum(valid * log_s) - sum(shifted[target]) is preserved.
    row0 = lax.broadcasted_iota(jnp.int32, (C, _LANE), 0) == 0
    ce_part = jnp.where(row0, logs_lane, zero) - shifted_tgt          # (C, 128)

    out_ref[0, 0] += inter
    out_ref[0, 1] += psum
    out_ref[0, 2] += cnt
    out_ref[0, 3] += ce_part


def _pick_spatial_tiling(hw, num_classes, itemsize, max_tile_rows=None):
    """Choose (s_tile, s_pad) sublane-row counts for the (S, 128) spatial layout."""
    s_raw = pl.cdiv(hw, _LANE)
    out_bytes = _NSTAT * num_classes * _LANE * 4
    per_row = 2 * (num_classes * _LANE * itemsize + _LANE * 4)   # double-buffered inputs
    max_rows = (_VMEM_TILE_BUDGET - out_bytes) // per_row
    max_rows = min(int(max_rows), _MAX_S_TILE)
    if max_tile_rows is not None:
        max_rows = min(max_rows, int(max_tile_rows))
    max_rows = max(8, (max_rows // 8) * 8)

    if s_raw <= max_rows:
        return s_raw, s_raw                      # full spatial extent, no padding
    # Prefer a divisor of s_raw (multiple of 8) so preds never need an HBM pad copy.
    for st in range(max_rows, 7, -8):
        if s_raw % st == 0:
            return st, s_raw
    st = max_rows
    return st, pl.cdiv(s_raw, st) * st


def combined_loss(preds, targets, *, weight_dice=0.5, weight_ce=0.5, smooth=1.0,
                  max_tile_rows=None):
    """preds: (B, C, H, W) float; targets: (B, H, W) int -> scalar float32 loss."""
    B, C, H, W = preds.shape
    HW = H * W

    s_tile, s_pad = _pick_spatial_tiling(HW, C, preds.dtype.itemsize, max_tile_rows)
    hw_pad = s_pad * _LANE
    has_pad = hw_pad != HW

    preds_flat = preds.reshape(B, C, HW)             # keep input dtype for the HBM->VMEM DMA
    tgt_flat = targets.reshape(B, HW).astype(jnp.int32)
    if has_pad:
        # Only hit when HW is ragged w.r.t. the (s_pad, 128) layout; padded pixels are
        # marked with target=-1 and masked out of every statistic in-kernel.
        preds_flat = jnp.pad(preds_flat, ((0, 0), (0, 0), (0, hw_pad - HW)))
        tgt_flat = jnp.pad(tgt_flat, ((0, 0), (0, hw_pad - HW)), constant_values=-1)

    preds_4d = preds_flat.reshape(B, C, s_pad, _LANE)
    tgt_3d = tgt_flat.reshape(B, s_pad, _LANE)

    total_h = s_pad // s_tile
    # v7x has 2 TensorCores: with a single batch, split the spatial accumulation
    # across a leading parallel axis so both cores get work (partials summed below).
    n_split = 2 if (B == 1 and total_h >= 2 and total_h % 2 == 0) else 1
    h_per = total_h // n_split
    grid = (n_split, B, h_per)

    bytes_accessed = int(
        preds_4d.size * preds_4d.dtype.itemsize
        + tgt_3d.size * tgt_3d.dtype.itemsize
        + n_split * B * _NSTAT * C * _LANE * 4
    )
    cost = pl.CostEstimate(
        flops=int(12 * B * C * hw_pad),
        transcendentals=int(B * C * hw_pad + 2 * B * hw_pad),
        bytes_accessed=bytes_accessed,
    )

    kernel = functools.partial(_combined_loss_stats_kernel, has_pad=has_pad)

    stats = pl.pallas_call(
        kernel,
        out_shape=jax.ShapeDtypeStruct((n_split * B, _NSTAT, C, _LANE), jnp.float32),
        grid=grid,
        in_specs=[
            pl.BlockSpec((1, C, s_tile, _LANE),
                         lambda p, b, h: (b, 0, p * h_per + h, 0)),
            pl.BlockSpec((1, s_tile, _LANE),
                         lambda p, b, h: (b, p * h_per + h, 0)),
        ],
        out_specs=pl.BlockSpec((1, _NSTAT, C, _LANE),
                               lambda p, b, h: (p * B + b, 0, 0, 0)),
        compiler_params=pltpu.CompilerParams(
            dimension_semantics=("parallel", "parallel", "arbitrary"),
            vmem_limit_bytes=32 * 1024 * 1024,
        ),
        cost_estimate=cost,
    )(preds_4d, tgt_3d)

    # Tiny epilogue in plain JAX (weights / smooth never enter the kernel).
    stats = stats.reshape(n_split, B, _NSTAT, C, _LANE).sum(axis=0)   # fold spatial splits
    inter = jnp.sum(stats[:, 0], axis=-1)            # (B, C)
    psum = jnp.sum(stats[:, 1], axis=-1)             # (B, C)
    cnt = jnp.sum(stats[:, 2], axis=-1)              # (B, C)
    ce_sum = jnp.sum(stats[:, 3])                    # scalar: sum(log_s) - sum(shifted[tgt])

    ce_loss = ce_sum / jnp.float32(B * HW)           # CrossEntropyLoss 'mean' over real pixels
    dice_coeff = (2.0 * inter + smooth) / (psum + cnt + smooth)
    dice_loss = jnp.mean(1.0 - jnp.mean(dice_coeff, axis=1))
    return weight_ce * ce_loss + weight_dice * dice_loss


def _reference_combined_loss(preds, targets, weight_dice=0.5, weight_ce=0.5, smooth=1.0):
    # Pure-JAX reference mirroring the PyTorch module.
    B, C, H, W = preds.shape
    logits = preds.astype(jnp.float32)
    log_sm = jax.nn.log_softmax(logits, axis=1)
    one_hot = jax.nn.one_hot(targets, C, axis=1, dtype=jnp.float32)  # (B, C, H, W)
    ce = -jnp.mean(jnp.sum(one_hot * log_sm, axis=1))
    p = jax.nn.softmax(logits, axis=1).reshape(B, C, -1)
    t = one_hot.reshape(B, C, -1)
    inter = jnp.sum(p * t, axis=2)
    union = jnp.sum(p, axis=2) + jnp.sum(t, axis=2)
    dice_coeff = (2.0 * inter + smooth) / (union + smooth)
    dice = jnp.mean(1.0 - jnp.mean(dice_coeff, axis=1))
    return weight_ce * ce + weight_dice * dice


if __name__ == "__main__":
    key = jax.random.PRNGKey(0)
    k1, k2 = jax.random.split(key)

    # Test 1: baseline small shape (no padding, single spatial step, B-parallel).
    B, C, H, W = 2, 4, 16, 16
    preds = jax.random.normal(k1, (B, C, H, W), dtype=jnp.float32)
    targets = jax.random.randint(k2, (B, H, W), 0, C, dtype=jnp.int32)
    loss = combined_loss(preds, targets)
    jax.block_until_ready(loss)
    ref = _reference_combined_loss(preds, targets)
    assert jnp.allclose(loss, ref, atol=1e-5, rtol=1e-5), ("test1", loss, ref)

    # Test 2: B=1 with a forced small tile -> exercises multi-step spatial
    # accumulation AND the 2-way spatial-split parallel axis (v7x 2-TC path).
    k3, k4 = jax.random.split(k1)
    preds2 = jax.random.normal(k3, (1, 4, 64, 64), dtype=jnp.float32)
    targets2 = jax.random.randint(k4, (1, 64, 64), 0, 4, dtype=jnp.int32)
    loss2 = combined_loss(preds2, targets2, max_tile_rows=8)
    jax.block_until_ready(loss2)
    ref2 = _reference_combined_loss(preds2, targets2)
    assert jnp.allclose(loss2, ref2, atol=1e-5, rtol=1e-5), ("test2", loss2, ref2)

    # Test 3: ragged spatial size (H*W not a multiple of 128) -> padded/masked path.
    k5, k6 = jax.random.split(k2)
    preds3 = jax.random.normal(k5, (2, 4, 10, 10), dtype=jnp.float32)
    targets3 = jax.random.randint(k6, (2, 10, 10), 0, 4, dtype=jnp.int32)
    loss3 = combined_loss(preds3, targets3)
    jax.block_until_ready(loss3)
    ref3 = _reference_combined_loss(preds3, targets3)
    assert jnp.allclose(loss3, ref3, atol=1e-5, rtol=1e-5), ("test3", loss3, ref3)

    print("KERNEL_OK")
</pallas_src>

<mosaic_0001>
module attributes {stable_mosaic.version = 11 : i64} {
  func.func @_combined_loss_stats_kernel(%arg0: i32, %arg1: i32, %arg2: i32, %arg3: memref<1x4x2x128xf32, #tpu.memory_space<vmem>>, %arg4: memref<1x2x128xi32, #tpu.memory_space<vmem>>, %arg5: memref<1x4x4x128xf32, #tpu.memory_space<vmem>>) attributes {dimension_semantics = [#tpu.dimension_semantics<parallel>, #tpu.dimension_semantics<parallel>, #tpu.dimension_semantics<arbitrary>], iteration_bounds = array<i64: 1, 2, 1>, scalar_prefetch = 0 : i64, scratch_operands = 0 : i64, tpu.core_type = #tpu.core_type<tc>, window_params = [{transform_indices = @transform_0, window_bounds = array<i64: 1, 4, 2, 128>}, {transform_indices = @transform_1, window_bounds = array<i64: 1, 2, 128>}, {transform_indices = @transform_2, window_bounds = array<i64: 1, 4, 4, 128>}]} {
    %c0_i32 = arith.constant 0 : i32
    %0 = arith.cmpi eq, %arg2, %c0_i32 : i32
    %1 = arith.extui %0 : i1 to i32
    %c0_i32_0 = arith.constant 0 : i32
    %2 = arith.cmpi ne, %1, %c0_i32_0 : i32
    scf.if %2 {
      %cst_46 = arith.constant 0.000000e+00 : f32
      %67 = vector.broadcast %cst_46 : f32 to vector<1x4x4x128xf32>
      %c0_47 = arith.constant 0 : index
      %c0_48 = arith.constant 0 : index
      %c0_49 = arith.constant 0 : index
      %c0_50 = arith.constant 0 : index
      %68 = vector.load %arg5[%c0_47, %c0_48, %c0_49, %c0_50] : memref<1x4x4x128xf32, #tpu.memory_space<vmem>>, vector<1x4x4x128xf32>
      tpu.vector_store %arg5[%c0_47, %c0_48, %c0_49, %c0_50], %67 {strides = array<i32>} : memref<1x4x4x128xf32, #tpu.memory_space<vmem>>, vector<1x4x4x128xf32>,
    } else {
    }
    %c0 = arith.constant 0 : index
    %c0_1 = arith.constant 0 : index
    %c0_2 = arith.constant 0 : index
    %c0_3 = arith.constant 0 : index
    %3 = vector.load %arg3[%c0, %c0_1, %c0_2, %c0_3] : memref<1x4x2x128xf32, #tpu.memory_space<vmem>>, vector<1x4x2x128xf32>
    %4 = vector.shape_cast %3 : vector<1x4x2x128xf32> to vector<4x2x128xf32>
    %c0_4 = arith.constant 0 : index
    %c0_5 = arith.constant 0 : index
    %c0_6 = arith.constant 0 : index
    %5 = vector.load %arg4[%c0_4, %c0_5, %c0_6] : memref<1x2x128xi32, #tpu.memory_space<vmem>>, vector<1x2x128xi32>
    %6 = vector.shape_cast %5 : vector<1x2x128xi32> to vector<2x128xi32>
    %cst = arith.constant dense<0xFF800000> : vector<2x128xf32>
    %7 = vector.multi_reduction <maximumf>, %4, %cst [0] : vector<4x2x128xf32> to vector<2x128xf32>
    %8 = vector.shape_cast %7 : vector<2x128xf32> to vector<1x2x128xf32>
    %9 = vector.broadcast %8 : vector<1x2x128xf32> to vector<4x2x128xf32>
    %10 = arith.subf %4, %9 : vector<4x2x128xf32>
    %11 = math.exp %10 : vector<4x2x128xf32>
    %cst_7 = arith.constant dense<0.000000e+00> : vector<2x128xf32>
    %12 = vector.multi_reduction <add>, %11, %cst_7 [0] : vector<4x2x128xf32> to vector<2x128xf32>
    %13 = vector.shape_cast %12 : vector<2x128xf32> to vector<1x2x128xf32>
    %14 = tpu.reciprocal %13 : vector<1x2x128xf32> -> vector<1x2x128xf32>
    %15 = math.log %13 : vector<1x2x128xf32>
    %16 = vector.broadcast %14 : vector<1x2x128xf32> to vector<4x2x128xf32>
    %17 = arith.mulf %11, %16 : vector<4x2x128xf32>
    %18 = tpu.iota {dimensions = array<i32: 0>} : vector<4x2x128xi32>
    %19 = vector.shape_cast %6 : vector<2x128xi32> to vector<1x2x128xi32>
    %20 = vector.broadcast %19 : vector<1x2x128xi32> to vector<4x2x128xi32>
    %21 = arith.cmpi eq, %18, %20 : vector<4x2x128xi32>
    %cst_8 = arith.constant 0.000000e+00 : f32
    %22 = vector.broadcast %cst_8 : f32 to vector<4x2x128xf32>
    %23 = arith.select %21, %17, %22 : vector<4x2x128xi1>, vector<4x2x128xf32>
    %cst_9 = arith.constant dense<0.000000e+00> : vector<4x128xf32>
    %24 = vector.multi_reduction <add>, %23, %cst_9 [1] : vector<4x2x128xf32> to vector<4x128xf32>
    %25 = arith.extui %21 : vector<4x2x128xi1> to vector<4x2x128xi32>
    %26 = arith.sitofp %25 : vector<4x2x128xi32> to vector<4x2x128xf32>
    %cst_10 = arith.constant dense<0.000000e+00> : vector<4x128xf32>
    %27 = vector.multi_reduction <add>, %26, %cst_10 [1] : vector<4x2x128xf32> to vector<4x128xf32>
    %cst_11 = arith.constant 0.000000e+00 : f32
    %28 = vector.broadcast %cst_11 : f32 to vector<4x2x128xf32>
    %29 = arith.select %21, %10, %28 : vector<4x2x128xi1>, vector<4x2x128xf32>
    %cst_12 = arith.constant dense<0.000000e+00> : vector<4x128xf32>
    %30 = vector.multi_reduction <add>, %29, %cst_12 [1] : vector<4x2x128xf32> to vector<4x128xf32>
    %cst_13 = arith.constant dense<0.000000e+00> : vector<4x128xf32>
    %31 = vector.multi_reduction <add>, %17, %cst_13 [1] : vector<4x2x128xf32> to vector<4x128xf32>
    %32 = vector.shape_cast %15 : vector<1x2x128xf32> to vector<2x128xf32>
    %cst_14 = arith.constant dense<0.000000e+00> : vector<128xf32>
    %33 = vector.multi_reduction <add>, %32, %cst_14 [0] : vector<2x128xf32> to vector<128xf32>
    %34 = vector.shape_cast %33 : vector<128xf32> to vector<1x128xf32>
    %35 = tpu.iota {dimensions = array<i32: 0>} : vector<4x128xi32>
    %c0_i32_15 = arith.constant 0 : i32
    %36 = vector.broadcast %c0_i32_15 : i32 to vector<4x128xi32>
    %37 = arith.cmpi eq, %35, %36 : vector<4x128xi32>
    %cst_16 = arith.constant 0.000000e+00 : f32
    %38 = vector.shape_cast %34 : vector<1x128xf32> to vector<1x128xf32>
    %39 = vector.broadcast %38 : vector<1x128xf32> to vector<4x128xf32>
    %40 = vector.broadcast %cst_16 : f32 to vector<4x128xf32>
    %41 = arith.select %37, %39, %40 : vector<4x128xi1>, vector<4x128xf32>
    %42 = arith.subf %41, %30 : vector<4x128xf32>
    %c0_17 = arith.constant 0 : index
    %c0_18 = arith.constant 0 : index
    %c0_19 = arith.constant 0 : index
    %c0_20 = arith.constant 0 : index
    %43 = vector.load %arg5[%c0_17, %c0_18, %c0_19, %c0_20] : memref<1x4x4x128xf32, #tpu.memory_space<vmem>>, vector<1x1x4x128xf32>
    %44 = vector.shape_cast %43 : vector<1x1x4x128xf32> to vector<4x128xf32>
    %45 = arith.addf %44, %24 : vector<4x128xf32>
    %c0_21 = arith.constant 0 : index
    %c0_22 = arith.constant 0 : index
    %c0_23 = arith.constant 0 : index
    %c0_24 = arith.constant 0 : index
    %46 = vector.load %arg5[%c0_21, %c0_22, %c0_23, %c0_24] : memref<1x4x4x128xf32, #tpu.memory_space<vmem>>, vector<1x1x4x128xf32>
    %47 = vector.shape_cast %46 : vector<1x1x4x128xf32> to vector<4x128xf32>
    %48 = vector.shape_cast %45 : vector<4x128xf32> to vector<1x1x4x128xf32>
    tpu.vector_store %arg5[%c0_21, %c0_22, %c0_23, %c0_24], %48 {strides = array<i32>} : memref<1x4x4x128xf32, #tpu.memory_space<vmem>>, vector<1x1x4x128xf32>,
    %c0_25 = arith.constant 0 : index
    %c1 = arith.constant 1 : index
    %c0_26 = arith.constant 0 : index
    %c0_27 = arith.constant 0 : index
    %49 = vector.load %arg5[%c0_25, %c1, %c0_26, %c0_27] : memref<1x4x4x128xf32, #tpu.memory_space<vmem>>, vector<1x1x4x128xf32>
    %50 = vector.shape_cast %49 : vector<1x1x4x128xf32> to vector<4x128xf32>
    %51 = arith.addf %50, %31 : vector<4x128xf32>
    %c0_28 = arith.constant 0 : index
    %c1_29 = arith.constant 1 : index
    %c0_30 = arith.constant 0 : index
    %c0_31 = arith.constant 0 : index
    %52 = vector.load %arg5[%c0_28, %c1_29, %c0_30, %c0_31] : memref<1x4x4x128xf32, #tpu.memory_space<vmem>>, vector<1x1x4x128xf32>
    %53 = vector.shape_cast %52 : vector<1x1x4x128xf32> to vector<4x128xf32>
    %54 = vector.shape_cast %51 : vector<4x128xf32> to vector<1x1x4x128xf32>
    tpu.vector_store %arg5[%c0_28, %c1_29, %c0_30, %c0_31], %54 {strides = array<i32>} : memref<1x4x4x128xf32, #tpu.memory_space<vmem>>, vector<1x1x4x128xf32>,
    %c0_32 = arith.constant 0 : index
    %c2 = arith.constant 2 : index
    %c0_33 = arith.constant 0 : index
    %c0_34 = arith.constant 0 : index
    %55 = vector.load %arg5[%c0_32, %c2, %c0_33, %c0_34] : memref<1x4x4x128xf32, #tpu.memory_space<vmem>>, vector<1x1x4x128xf32>
    %56 = vector.shape_cast %55 : vector<1x1x4x128xf32> to vector<4x128xf32>
    %57 = arith.addf %56, %27 : vector<4x128xf32>
    %c0_35 = arith.constant 0 : index
    %c2_36 = arith.constant 2 : index
    %c0_37 = arith.constant 0 : index
    %c0_38 = arith.constant 0 : index
    %58 = vector.load %arg5[%c0_35, %c2_36, %c0_37, %c0_38] : memref<1x4x4x128xf32, #tpu.memory_space<vmem>>, vector<1x1x4x128xf32>
    %59 = vector.shape_cast %58 : vector<1x1x4x128xf32> to vector<4x128xf32>
    %60 = vector.shape_cast %57 : vector<4x128xf32> to vector<1x1x4x128xf32>
    tpu.vector_store %arg5[%c0_35, %c2_36, %c0_37, %c0_38], %60 {strides = array<i32>} : memref<1x4x4x128xf32, #tpu.memory_space<vmem>>, vector<1x1x4x128xf32>,
    %c0_39 = arith.constant 0 : index
    %c3 = arith.constant 3 : index
    %c0_40 = arith.constant 0 : index
    %c0_41 = arith.constant 0 : index
    %61 = vector.load %arg5[%c0_39, %c3, %c0_40, %c0_41] : memref<1x4x4x128xf32, #tpu.memory_space<vmem>>, vector<1x1x4x128xf32>
    %62 = vector.shape_cast %61 : vector<1x1x4x128xf32> to vector<4x128xf32>
    %63 = arith.addf %62, %42 : vector<4x128xf32>
    %c0_42 = arith.constant 0 : index
    %c3_43 = arith.constant 3 : index
    %c0_44 = arith.constant 0 : index
    %c0_45 = arith.constant 0 : index
    %64 = vector.load %arg5[%c0_42, %c3_43, %c0_44, %c0_45] : memref<1x4x4x128xf32, #tpu.memory_space<vmem>>, vector<1x1x4x128xf32>
    %65 = vector.shape_cast %64 : vector<1x1x4x128xf32> to vector<4x128xf32>
    %66 = vector.shape_cast %63 : vector<4x128xf32> to vector<1x1x4x128xf32>
    tpu.vector_store %arg5[%c0_42, %c3_43, %c0_44, %c0_45], %66 {strides = array<i32>} : memref<1x4x4x128xf32, #tpu.memory_space<vmem>>, vector<1x1x4x128xf32>,
    return
  }
  func.func @transform_0(%arg0: i32, %arg1: i32, %arg2: i32) -> (i32, i32, i32, i32) {
    %c1_i32 = arith.constant 1 : i32
    %0 = arith.muli %arg0, %c1_i32 : i32
    %1 = arith.addi %0, %arg2 : i32
    %c0_i32 = arith.constant 0 : i32
    %c0_i32_0 = arith.constant 0 : i32
    %c0_i32_1 = arith.constant 0 : i32
    return %arg1, %c0_i32, %1, %c0_i32_0 : i32, i32, i32, i32
  }
  func.func @transform_1(%arg0: i32, %arg1: i32, %arg2: i32) -> (i32, i32, i32) {
    %c1_i32 = arith.constant 1 : i32
    %0 = arith.muli %arg0, %c1_i32 : i32
    %1 = arith.addi %0, %arg2 : i32
    %c0_i32 = arith.constant 0 : i32
    %c0_i32_0 = arith.constant 0 : i32
    return %arg1, %1, %c0_i32 : i32, i32, i32
  }
  func.func @transform_2(%arg0: i32, %arg1: i32, %arg2: i32) -> (i32, i32, i32, i32) {
    %c2_i32 = arith.constant 2 : i32
    %0 = arith.muli %arg0, %c2_i32 : i32
    %1 = arith.addi %0, %arg1 : i32
    %c0_i32 = arith.constant 0 : i32
    %c0_i32_0 = arith.constant 0 : i32
    %c0_i32_1 = arith.constant 0 : i32
    %c0_i32_2 = arith.constant 0 : i32
    return %1, %c0_i32, %c0_i32_0, %c0_i32_1 : i32, i32, i32, i32
  }
}

</mosaic_0001>

<bundles_post_ra>
// kernel: tpu_custom_call.1
= control target key start
LH: loop header
LB: loop body
LE: loop exit
PB: predicated region body
PF: predicated region fallthrough
CT: control target
= control target key end

     0   :  { %7 = vsyncpa [#allocation3], 0  ;;  %s1164_s0 = inlined_call_operand.hbm [shape: f32[2,4,2,128], index: 0, kind: input, shape index: {}]   ;;  %s1165_s1 = inlined_call_operand.hbm [shape: s32[2,2,128], index: 1, kind: input, shape index: {}]   ;;  %s1166_s2 = inlined_call_operand.hbm [shape: f32[2,4,4,128], index: 2, kind: output, shape index: {}]  }
   0x1   :  { %9 = vsyncpa [#allocation3 + $0x1], 0 }
   0x2   :  { %10 = vsyncpa [#allocation6], 0 }
   0x3   :  { %12 = vsyncpa [#allocation6 + $0x1], 0 }
   0x4   :  { %13 = vsyncpa [#allocation4], 0 }
   0x5   :  { %15 = vsyncpa [#allocation4 + $0x1], 0  ;;  %s910_s9 = smov 0   ;;  %s912_s10 = smov 0  }
   0x6   :  { %s914_s11 = smov 0   ;;  %s916_s12 = smov 0  }
   0x7   :  { %s918_s13 = smov 0   ;;  %s920_s14 = smov 0  }
   0x8 LB: > { %s628_s15 = sadd.s32 4294967295, %s888_s14   ;;  %s629_s16 = sadd.s32 4294967294, %s888_s14   ;;  %s888_s14 = sphi %s920_s14, %s21_s14   ;;  %s884_s13 = sphi %s918_s13, %s1176_s13   ;;  %s880_s12 = sphi %s916_s12, %s1175_s12   ;;  %s876_s11 = sphi %s914_s11, %s1174_s11   ;;  %s872_s10 = sphi %s912_s10, %s1173_s10   ;;  %s868_s9 = sphi %s910_s9, %s1172_s9  }
   0x9   : > { %s36_s17 = sadd.s32 1, %s884_s13  ;;  %s51_s18 = sadd.s32 1, %s876_s11 }
   0xa   : > { %p38_p0 = scmp.ge.s32.totalorder %s36_s17, 2  ;;  %p58_p1 = scmp.ne.s32.totalorder %s876_s11, %s872_s10 }
   0xb   : > { %p59_p2 = scmp.eq.s32.totalorder %s888_s14, 0  ;;  %p64_p3 = scmp.ne.s32.totalorder %s872_s10, %s868_s9 }
   0xc   : > { %s1178_s17 = smov (%p38_p0, %s36_s17), 0  ;;  %p65_p5 = scmp.eq.s32.totalorder %s628_s15, 0 }
   0xd   : > { %p951_p4 = por %p59_p2, %p58_p1  ;;  %s46_s20 = ssub.s32 %s884_s13, %s1178_s17 }
   0xe   : > { %p122_p6 = scmp.eq.s32.totalorder %s628_s15, 1  ;;  %p49_p7 = scmp.eq.s32.totalorder %s46_s20, 0 }
   0xf   : > { %p957_p8 = por %p65_p5, %p64_p3  ;;  %p128_p10 = scmp.eq.s32.totalorder %s629_s16, 1 }
  0x10   : > { %p961_p9 = por %p122_p6, %p58_p1  ;;  %p631_p12 = scmp.ge.s32.totalorder %s888_s14, 2 }
  0x11   : > { %s966_s23 = scalar_select %p49_p7, %s876_s11, %s51_s18  }
  0x12   : > { %p968_p11 = por %p128_p10, %p64_p3  ;;  %p675_p13 = scmp.lt.s32.totalorder %s888_s14, 2 }
  0x13   : > { %s148_s25 = sand.u32 1, %s876_s11   ;;  %s656_s27 = sshll.u32 %s884_s13, 3 }
  0x14   : > { %s632_s26 = sshll.u32 %s148_s25, 3  ;;  %s159_s30 = scalar_lea.hbm %s1164_s0, %s656_s27 }
  0x15   : > { %s152_s3 = scalar_lea.vmem [#allocation2], %s632_s26  ;;  %s160_s5 = sshll.u32 %s159_s30, 4  ;;  %s161_s5 = int_to_ptr.hbm [resolvable:$true] %s160_s5 }
  0x16   : > { %s162_s4 = sshll.u32 %s152_s3, 4  ;;  %p981_p0 = pnand %p675_p13, %p951_p4  ;;  %s163_s4 = int_to_ptr.vmem [resolvable:$true] %s162_s4 }
  0x17   : > { %p637_p1 = scmp.ge.s32.totalorder %s888_s14, 1  ;;  %s149_s7 = scalar_lea.sflag [#allocation3], %s148_s25 }
  0x18   : > { %s890_s8 = smov 32   ;;  %s891_s15 = smov 2  }
  0x19   : > { %667 = dma.hbm_to_vmem [thread:$0]  (!%p981_p0), %s161_s5, 128, %s163_s4, %s149_s7, %s890_s8, %s890_s8, %s891_s15  }
  0x1a   : > { %p191_p2 = scmp.lt.s32.totalorder %s888_s14, 3  ;;  %s635_s16 = sshll.u32 %s148_s25, 1 }
  0x1b   : > { %s636_s18 = sshll.u32 %s884_s13, 1  ;;  %s176_s27 = scalar_lea.vmem [#allocation5], %s635_s16 }
  0x1c   : > { %p192_p3 = pnand %p637_p1, %p191_p2  ;;  %s182_s19 = scalar_lea.hbm %s1165_s1, %s636_s18 }
  0x1d   : > { %s186_s28 = sshll.u32 %s176_s27, 4  ;;  %s184_s29 = sshll.u32 %s182_s19, 4  ;;  %s187_s28 = int_to_ptr.vmem [resolvable:$true] %s186_s28  ;;  %s185_s29 = int_to_ptr.hbm [resolvable:$true] %s184_s29 }
  0x1e   : > { %s173_s30 = scalar_lea.sflag [#allocation6], %s148_s25  ;;  %195 = sbr.rel (%p192_p3) target bundleno = 112 (0x70), region = 28 }
  0x1f   : > { %670 = dma.hbm_to_vmem [thread:$0]  (!%p981_p0), %s185_s29, 32, %s187_s28, %s173_s30  }
  0x20   : > { %s996_s3 = sand.u32 (!%p192_p3), 1, %s872_s10  }
  0x21   : > { %s638_s4 = sshll.u32 (!%p192_p3), %s996_s3, 3  ;;  %s198_s5 = scalar_lea.sflag (!%p192_p3), [#allocation3], %s996_s3 }
  0x22   : > { %s201_s7 = scalar_lea.vmem (!%p192_p3), [#allocation2], %s638_s4 }
  0x23   : > { %855 = dma.done.wait (%p957_p8), %s198_s5, 128  }
  0x24   : > { %857 = vsyncadd (%p957_p8), %s198_s5, 4294967168  ;;  %s639_s25 = sshll.u32 %s996_s3, 1  ;;  %s208_s6 = scalar_lea.sflag [#allocation6], %s996_s3 }
  0x25   : > { %s211_s8 = scalar_lea.vmem [#allocation5], %s639_s25 }
  0x26   : > { %859 = dma.done.wait (%p957_p8), %s208_s6, 32  }
  0x27   : > { %861 = vsyncadd (%p957_p8), %s208_s6, 4294967264  ;;  %s640_s15 = sshll.u32 %s996_s3, 4  ;;  %v892_v0 = vmov 0.0   ;;  %vm255_vm0 = vcmask 1041408   ;;  %v250_v1 = vld [vmem:[%s201_s7] sm:$0x3] }
  0x28   : > { %s1011_s16 = scalar_lea.vmem [#allocation7], %s640_s15  ;;  %v251_v2 = vld [vmem:[%s201_s7 + $0x2] sm:$0x3]  ;;  %v252_v3 = vld [vmem:[%s201_s7 + $0x4] sm:$0x3]  ;;  %v256_v5 = vsel %vm255_vm0, %v250_v1, -inf }
  0x29   : > { %246 = vst [vmem:[%s1011_s16] sm:$0xf] %v892_v0  ;;  %v253_v4 = vld [vmem:[%s201_s7 + $0x6] sm:$0x3]  ;;  %v257_v6 = vsel %vm255_vm0, %v251_v2, -inf  ;;  %v258_v7 = vsel %vm255_vm0, %v252_v3, -inf  ;;  %vm449_vm5 = vcmask 1041409  }
  0x2a   : > { %247 = vst [vmem:[%s1011_s16 + $0x4] sm:$0xf] %v892_v0  ;;  %v259_v8 = vsel %vm255_vm0, %v253_v4, -inf  ;;  %v260_v9 = vmax.f32 %v256_v5, %v257_v6  ;;  %v1021_v16 = vld [vmem:[%s211_s8] sm:$0x3]  ;;  %vm451_vm6 = vcmask 1042434  }
  0x2b   : > { %248 = vst [vmem:[%s1011_s16 + $0x8] sm:$0xf] %v892_v0  ;;  %v261_v10 = vmax.f32 %v258_v7, %v259_v8  ;;  %vm302_vm1 = vcmp.eq.s32.totalorder %v1021_v16, 0  ;;  %vm303_vm2 = vcmp.eq.s32.totalorder %v1021_v16, 1  ;;  %vm304_vm3 = vcmp.eq.s32.totalorder %v1021_v16, 2  ;;  %s657_s21 = sshll.u32 %s880_s12, 4 }
  0x2c   : > { %249 = vst [vmem:[%s1011_s16 + $0xc] sm:$0xf] %v892_v0  ;;  %vm305_vm4 = vcmp.eq.s32.totalorder %v1021_v16, 3  ;;  %v641_v24 = vsel %vm302_vm1, 1.0, %v892_v0  ;;  %v642_v25 = vsel %vm303_vm2, 1.0, %v892_v0  ;;  %v643_v28 = vsel %vm304_vm3, 1.0, %v892_v0  ;;  %s510_s12 = scalar_lea.hbm %s1166_s2, %s657_s21 }
  0x2d   : > { %v262_v11 = vmax.f32 %v260_v9, %v261_v10  ;;  %v346_v29 = vsel %vm255_vm0, %v641_v24, 0.0  ;;  %v353_v30 = vsel %vm255_vm0, %v642_v25, 0.0  ;;  %v644_v34 = vsel %vm305_vm4, 1.0, %v892_v0  ;;  %s511_s26 = sshll.u32 %s1011_s16, 4  ;;  %s513_s19 = sshll.u32 %s510_s12, 4  ;;  %s512_s26 = int_to_ptr.vmem [resolvable:$true] %s511_s26  ;;  %s514_s19 = int_to_ptr.hbm [resolvable:$true] %s513_s19 }
  0x2e   : > { %v347_v35 = vrot.slane %v346_v29, 4  ;;  %v354_v36 = vrot.slane %v353_v30, 4  ;;  %v360_v39 = vsel %vm255_vm0, %v643_v28, 0.0  ;;  %v367_v40 = vsel %vm255_vm0, %v644_v34, 0.0  ;;  %s497_s27 = scalar_lea.sflag [#allocation4], %s996_s3  ;;  %s816_s28 = sshra.s32 %s514_s19, 4  ;;  %s817_s28 = int_to_ptr.hbm [resolvable:$true] %s816_s28 }
  0x2f   : > { %v263_v12 = vsub.f32 %v250_v1, %v262_v11  ;;  %v264_v13 = vsub.f32 %v251_v2, %v262_v11  ;;  %v265_v14 = vsub.f32 %v252_v3, %v262_v11  ;;  %v266_v15 = vsub.f32 %v253_v4, %v262_v11  ;;  %s818_s29 = scalar_lea.hbm %s817_s28, 16  ;;  %s822_s5 = scalar_lea.hbm %s1166_s2, 32 }
  0x30   : > { %v348_v45 = vadd.f32 %v347_v35, %v346_v29  ;;  %v355_v46 = vadd.f32 %v354_v36, %v353_v30  ;;  %v361_v48 = vrot.slane %v360_v39, 4  ;;  %v368_v49 = vrot.slane %v367_v40, 4  ;;  %p819_p4 = scmp.ne.s32.totalorder %s817_s28, %s818_s29  ;;  %p823_p7 = scmp.lt.s32.totalorder %s817_s28, %s1166_s2 }
  0x31   : > { %v267_v17 = vmul.f32 1.442695, %v263_v12  ;;  %v269_v18 = vmul.f32 1.442695, %v264_v13  ;;  %v271_v19 = vmul.f32 1.442695, %v265_v14  ;;  %p824_p8 = scmp.lt.s32.totalorder %s822_s5, %s818_s29 }
  0x32   : > { %v273_v20 = vmul.f32 1.442695, %v266_v15  ;;  %v374_v21 = vsel %vm302_vm1, %v263_v12, 0.0  ;;  %v375_v22 = vsel %vm303_vm2, %v264_v13, 0.0  ;;  %v349_v52 = vrot.slane %v348_v45, 2  ;;  %p820_p5 = pnand %p819_p4, %p961_p9 }
  0x33   : > { %730 = vpow2.f32 %v267_v17  ;;  %v378_v23 = vsel %vm255_vm0, %v374_v21, 0.0  ;;  %v385_v31 = vsel %vm255_vm0, %v375_v22, 0.0  ;;  %v356_v53 = vrot.slane %v355_v46, 2  ;;  %v647_v21 = vld [vmem:[%s1011_s16 + $0x8] sm:$0xf]  ;;  %p825_p10 = por %p824_p8, %p823_p7 }
  0x34   : > { %732 = vpow2.f32 %v269_v18  ;;  %v379_v26 = vrot.slane %v378_v23, 4  ;;  %v386_v50 = vrot.slane %v385_v31, 4  ;;  %v362_v55 = vadd.f32 %v361_v48, %v360_v39  ;;  %p821_p6 = pneg %p820_p5 }
  0x35   : > { %734 = vpow2.f32 %v271_v19  ;;  %v369_v56 = vadd.f32 %v368_v49, %v367_v40  ;;  %v376_v57 = vsel %vm304_vm3, %v265_v14, 0.0  ;;  %v350_v59 = vadd.f32 %v349_v52, %v348_v45 }
  0x36   : > { %736 = vpow2.f32 %v273_v20  ;;  %v380_v41 = vadd.f32 %v379_v26, %v378_v23  ;;  %v357_v60 = vadd.f32 %v356_v53, %v355_v46  ;;  %v363_v61 = vrot.slane %v362_v55, 2  ;;  %p826_p13 = pnand %p825_p10, %p821_p6 }
  0x37   : > { %v370_v62 = vrot.slane %v369_v56, 2  ;;  %v377_v63 = vsel %vm305_vm4, %v266_v15, 0.0  ;;  %v387_v1 = vadd.f32 %v386_v50, %v385_v31  ;;  %v392_v2 = vsel %vm255_vm0, %v376_v57, 0.0 }
  0x38   : > { %v381_v54 = vrot.slane %v380_v41, 2  ;;  %v351_v3 = vrot.slane %v350_v59, 1  ;;  %v358_v4 = vrot.slane %v357_v60, 1  ;;  %v364_v5 = vadd.f32 %v363_v61, %v362_v55 }
  0x39   : > { %v1036_v27 = vpop.eup %730  ;;  %v371_v6 = vadd.f32 %v370_v62, %v369_v56  ;;  %vm453_vm7 = vcmask 1043459   ;;  %v388_v11 = vrot.slane %v387_v1, 2  ;;  %v393_v12 = vrot.slane %v392_v2, 4 }
  0x3a   : > { %v1043_v32 = vpop.eup %732  ;;  %v275_v33 = vsel %vm255_vm0, %v1036_v27, 0.0  ;;  %v382_v0 = vadd.f32 %v381_v54, %v380_v41  ;;  %v352_v7 = vadd.f32 %v351_v3, %v350_v59  ;;  %v359_v8 = vadd.f32 %v358_v4, %v357_v60 }
  0x3b   : > { %v1049_v37 = vpop.eup %734  ;;  %v276_v38 = vsel %vm255_vm0, %v1043_v32, 0.0  ;;  %v365_v9 = vrot.slane %v364_v5, 1  ;;  %v372_v10 = vrot.slane %v371_v6, 1  ;;  %v399_v13 = vsel %vm255_vm0, %v377_v63, 0.0 }
  0x3c   : > { %v1055_v42 = vpop.eup %736  ;;  %v277_v43 = vadd.f32 %v276_v38, %v275_v33  ;;  %v278_v44 = vsel %vm255_vm0, %v1049_v37, 0.0  ;;  %v486_v17 = vsel %vm449_vm5, %v359_v8, %v352_v7  ;;  %v400_v18 = vrot.slane %v399_v13, 4 }
  0x3d   : > { %v280_v47 = vsel %vm255_vm0, %v1055_v42, 0.0  ;;  %v366_v14 = vadd.f32 %v365_v9, %v364_v5  ;;  %v373_v15 = vadd.f32 %v372_v10, %v371_v6  ;;  %v383_v22 = vrot.slane %v382_v0, 1 }
  0x3e   : > { %v279_v51 = vadd.f32 %v278_v44, %v277_v43  ;;  %v389_v23 = vadd.f32 %v388_v11, %v387_v1  ;;  %v394_v24 = vadd.f32 %v393_v12, %v392_v2  ;;  %v401_v29 = vadd.f32 %v400_v18, %v399_v13 }
  0x3f   : > { %v487_v28 = vsel %vm451_vm6, %v366_v14, %v486_v17  ;;  %v384_v40 = vadd.f32 %v383_v22, %v382_v0  ;;  %v441_v54 = vlaneseq }
  0x40   : > { %v281_v58 = vadd.f32 %v280_v47, %v279_v51  ;;  %v488_v31 = vsel %vm453_vm7, %v373_v15, %v487_v28  ;;  %v390_v33 = vrot.slane %v389_v23, 1  ;;  %v395_v34 = vrot.slane %v394_v24, 2 }
  0x41   : > { %v490_v36 = vadd.f32 %v647_v21, %v488_v31  ;;  %v402_v39 = vrot.slane %v401_v29, 2  ;;  %v1084_v1 = vshrl.u32 %v441_v54, 7 }
  0x42   : > { %738 = vrcp.f32 %v281_v58  ;;  %vm287_vm8 = vweird.f32 %v281_v58  ;;  %v291_v20 = vand.u32 2147483647, %v281_v58  ;;  %v293_v26 = vand.u32 2147483648, %v281_v58 }
  0x43   : > { %740 = vlog2.f32 %v281_v58  ;;  %v396_v41 = vadd.f32 %v395_v34, %v394_v24  ;;  %648 = vst [vmem:[%s1011_s16 + $0x8] sm:$0xf] %v490_v36  ;;  %v391_v44 = vadd.f32 %v390_v33, %v389_v23  ;;  %v403_v45 = vadd.f32 %v402_v39, %v401_v29 }
  0x44   : > { %v294_v47 = vor.u32 1.1754944e-38, %v293_v26  ;;  %vm292_vm11 = vcmp.eq.f32.partialorder %v291_v20, 8.507059e+37  ;;  %vm443_vm12 = vcmp.eq.s32.totalorder %v1084_v1, 0 }
  0x45   : > { %v397_v48 = vrot.slane %v396_v41, 1  ;;  %v404_v52 = vrot.slane %v403_v45, 1  ;;  %v450_v56 = vsel %vm449_vm5, %v391_v44, %v384_v40 }
  0x47   : > { %v398_v51 = vadd.f32 %v397_v48, %v396_v41  ;;  %v1080_v63 = vadd.f32 %v404_v52, %v403_v45 }
  0x48   : > { %v739_v19 = vpop.eup %738 }
  0x49   : > { %v283_v25 = vmul.f32 %v739_v19, %v281_v58  ;;  %v741_v30 = vpop.eup %740  ;;  %vm288_vm9 = vweird.f32 %v739_v19  ;;  %v1087_v2 = vsel %vm451_vm6, %v398_v51, %v450_v56 }
  0x4a   : > { %v297_v38 = vmul.f32 0.6931472, %v741_v30  ;;  %vm289_vm10 = vmor %vm287_vm8, %vm288_vm9 }
  0x4b   : > { %v284_v35 = vsub.f32 1.0, %v283_v25 }
  0x4c   : > { %v434_v46 = vsel %vm255_vm0, %v297_v38, 0.0 }
  0x4d   : > { %v285_v43 = vmul.f32 %v739_v19, %v284_v35  ;;  %v435_v49 = vrot.slane %v434_v46, 4 }
  0x4f   : > { %v286_v50 = vadd.f32 %v739_v19, %v285_v43  ;;  %v436_v53 = vadd.f32 %v435_v49, %v434_v46 }
  0x51   : > { %v290_v55 = vsel %vm289_vm10, %v739_v19, %v286_v50  ;;  %v437_v59 = vrot.slane %v436_v53, 2 }
  0x52   : > { %v295_v57 = vsel %vm292_vm11, %v294_v47, %v290_v55 }
  0x53   : > { %v298_v60 = vmul.f32 %v1036_v27, %v295_v57  ;;  %v299_v61 = vmul.f32 %v1043_v32, %v295_v57  ;;  %v300_v58 = vmul.f32 %v1049_v37, %v295_v57  ;;  %v301_v62 = vmul.f32 %v1055_v42, %v295_v57 }
  0x54   : > { %v1082_v0 = vadd.f32 %v437_v59, %v436_v53 }
  0x55   : > { %v306_v3 = vsel %vm302_vm1, %v298_v60, 0.0  ;;  %v307_v27 = vsel %vm303_vm2, %v299_v61, 0.0  ;;  %v308_v32 = vsel %vm304_vm3, %v300_v58, 0.0  ;;  %v309_v37 = vsel %vm305_vm4, %v301_v62, 0.0 }
  0x56   : > { %v310_v42 = vsel %vm255_vm0, %v306_v3, 0.0  ;;  %v317_v4 = vsel %vm255_vm0, %v307_v27, 0.0  ;;  %v324_v5 = vsel %vm255_vm0, %v308_v32, 0.0  ;;  %v331_v6 = vsel %vm255_vm0, %v309_v37, 0.0 }
  0x57   : > { %v311_v7 = vrot.slane %v310_v42, 4  ;;  %v318_v8 = vrot.slane %v317_v4, 4  ;;  %v325_v9 = vrot.slane %v324_v5, 4  ;;  %v332_v10 = vrot.slane %v331_v6, 4 }
  0x58   : > { %v406_v11 = vsel %vm255_vm0, %v298_v60, 0.0  ;;  %v413_v12 = vsel %vm255_vm0, %v299_v61, 0.0  ;;  %v420_v13 = vsel %vm255_vm0, %v300_v58, 0.0  ;;  %v427_v16 = vsel %vm255_vm0, %v301_v62, 0.0  ;;  %v457_v60 = vld [vmem:[%s1011_s16] sm:$0xf] }
  0x59   : > { %v312_v14 = vadd.f32 %v311_v7, %v310_v42  ;;  %v319_v15 = vadd.f32 %v318_v8, %v317_v4  ;;  %v326_v17 = vadd.f32 %v325_v9, %v324_v5  ;;  %v333_v18 = vadd.f32 %v332_v10, %v331_v6  ;;  %v645_v7 = vld [vmem:[%s1011_s16 + $0x4] sm:$0xf] }
  0x5a   : > { %v407_v19 = vrot.slane %v406_v11, 4  ;;  %v414_v20 = vrot.slane %v413_v12, 4  ;;  %v421_v21 = vrot.slane %v420_v13, 4  ;;  %v428_v22 = vrot.slane %v427_v16, 4 }
  0x5b   : > { %v313_v23 = vrot.slane %v312_v14, 2  ;;  %v320_v24 = vrot.slane %v319_v15, 2  ;;  %v327_v25 = vrot.slane %v326_v17, 2  ;;  %v334_v26 = vrot.slane %v333_v18, 2 }
  0x5c   : > { %v408_v28 = vadd.f32 %v407_v19, %v406_v11  ;;  %v415_v29 = vadd.f32 %v414_v20, %v413_v12  ;;  %v422_v30 = vadd.f32 %v421_v21, %v420_v13  ;;  %v429_v31 = vadd.f32 %v428_v22, %v427_v16 }
  0x5d   : > { %v314_v33 = vadd.f32 %v313_v23, %v312_v14  ;;  %v321_v34 = vadd.f32 %v320_v24, %v319_v15  ;;  %v328_v35 = vadd.f32 %v327_v25, %v326_v17  ;;  %v335_v36 = vadd.f32 %v334_v26, %v333_v18 }
  0x5e   : > { %v409_v38 = vrot.slane %v408_v28, 2  ;;  %v416_v39 = vrot.slane %v415_v29, 2  ;;  %v423_v40 = vrot.slane %v422_v30, 2  ;;  %v430_v41 = vrot.slane %v429_v31, 2 }
  0x5f   : > { %v315_v43 = vrot.slane %v314_v33, 1  ;;  %v322_v44 = vrot.slane %v321_v34, 1  ;;  %v329_v45 = vrot.slane %v328_v35, 1  ;;  %v336_v46 = vrot.slane %v335_v36, 1 }
  0x60   : > { %v410_v47 = vadd.f32 %v409_v38, %v408_v28  ;;  %v417_v48 = vadd.f32 %v416_v39, %v415_v29  ;;  %v424_v49 = vadd.f32 %v423_v40, %v422_v30  ;;  %v431_v50 = vadd.f32 %v430_v41, %v429_v31 }
  0x61   : > { %v316_v51 = vadd.f32 %v315_v43, %v314_v33  ;;  %v323_v52 = vadd.f32 %v322_v44, %v321_v34  ;;  %v330_v53 = vadd.f32 %v329_v45, %v328_v35  ;;  %v337_v54 = vadd.f32 %v336_v46, %v335_v36 }
  0x62   : > { %v411_v55 = vrot.slane %v410_v47, 1  ;;  %v418_v56 = vrot.slane %v417_v48, 1  ;;  %v425_v57 = vrot.slane %v424_v49, 1  ;;  %v432_v59 = vrot.slane %v431_v50, 1 }
  0x63   : > { %v462_v61 = vsel %vm449_vm5, %v323_v52, %v316_v51  ;;  %v439_v58 = vrot.slane %v1082_v0, 1  ;;  %v454_v5 = vsel %vm453_vm7, %v1080_v63, %v1087_v2 }
  0x64   : > { %v463_v62 = vsel %vm451_vm6, %v330_v53, %v462_v61  ;;  %v412_v3 = vadd.f32 %v411_v55, %v410_v47  ;;  %v419_v27 = vadd.f32 %v418_v56, %v417_v48  ;;  %v426_v32 = vadd.f32 %v425_v57, %v424_v49 }
  0x65   : > { %v464_v37 = vsel %vm453_vm7, %v337_v54, %v463_v62  ;;  %v433_v42 = vadd.f32 %v432_v59, %v431_v50  ;;  %v440_v4 = vadd.f32 %v439_v58, %v1082_v0  ;;  %v649_v0 = vld [vmem:[%s1011_s16 + $0xc] sm:$0xf] }
  0x66   : > { %v466_v6 = vadd.f32 %v464_v37, %v457_v60  ;;  %v474_v8 = vsel %vm449_vm5, %v419_v27, %v412_v3 }
  0x67   : > { %v475_v9 = vsel %vm451_vm6, %v426_v32, %v474_v8  ;;  %v444_v10 = vsel %vm443_vm12, %v440_v4, 0.0 }
  0x68   : > { %467 = vst [vmem:[%s1011_s16] sm:$0xf] %v466_v6  ;;  %v476_v11 = vsel %vm453_vm7, %v433_v42, %v475_v9  ;;  %v456_v63 = vsub.f32 %v444_v10, %v454_v5 }
  0x69   : > { %v478_v2 = vadd.f32 %v645_v7, %v476_v11 }
  0x6a   : > { %v494_v12 = vadd.f32 %v649_v0, %v456_v63 }
  0x6b   : > { %646 = vst [vmem:[%s1011_s16 + $0x4] sm:$0xf] %v478_v2 }
  0x6c   : > { %650 = vst [vmem:[%s1011_s16 + $0xc] sm:$0xf] %v494_v12 }
  0x6d   : > { %829 = shalt.err (!%p826_p13)
}
  0x6e   : > { %s893_s3 = smov 64   ;;  %s894_s6 = smov 4  }
  0x6f   : > { %662 = dma.vmem_to_hbm [thread:$0]  (%p961_p9), %s512_s26, 256, %s514_s19, %s497_s27, %s893_s3, %s893_s3, %s894_s6  }
  0x70 PF: > { %s528_s8 = sand.u32 1, %s868_s9   ;;  %p672_p0 = pnand %p631_p12, %p968_p11 }
  0x71   : > { %s529_s15 = scalar_lea.sflag [#allocation4], %s528_s8 }
  0x72   : > { %p673_p1 = pneg %p672_p0 }
  0x74   : > { %863 = dma.done.wait (%p673_p1), %s529_s15, 256  }
  0x75   : > { %865 = vsyncadd (%p673_p1), %s529_s15, 4294967040  ;;  %s21_s14 = sadd.s32 1, %s888_s14   ;;  %s1172_s9 = smov %s872_s10 }
  0x76   : > { %p18_p2 = scmp.ge.s32.totalorder %s21_s14, 4   ;;  %s1173_s10 = smov %s876_s11 }
  0x77   : > { %s1174_s11 = smov %s966_s23  ;;  %s1175_s12 = smov %s884_s13 }
  0x78   : > { %s1176_s13 = smov %s1178_s17  ;;  %20 = sbr.rel (!%p18_p2) target bundleno = 8 (0x8), region = 93 }
  0x7d   :  { %535 = vsyncpa [#allocation3], 1 }
  0x7e   :  { %537 = vsyncpa [#allocation3 + $0x1], 1 }
  0x7f   :  { %538 = vsyncpa [#allocation6], 1 }
  0x80   :  { %540 = vsyncpa [#allocation6 + $0x1], 1 }
  0x81   :  { %541 = vsyncpa [#allocation4], 1 }
  0x82   :  { %543 = vsyncpa [#allocation4 + $0x1], 1 }

</bundles_post_ra>
